<compile_context>
chip_gen: v7x
topology: tpu7x:2x2x1
jax: 0.10.0
libtpu: 0.0.40
codegen_flags: <defaults>
</compile_context>

<pallas_src>
import functools
import math

import numpy as np

import jax
import jax.numpy as jnp
from jax import lax
from jax.experimental import pallas as pl
from jax.experimental.pallas import tpu as pltpu


# ----------------------------------------------------------------------------
# Pallas kernel: implicit-GEMM stride-1 "valid" convolution + bias + PReLU
# ----------------------------------------------------------------------------
def _conv_gemm_kernel(x_ref, w_ref, b_ref, a_ref, o_ref, acc_ref, *, D, Ho, Wo):
    """x_ref: (Hp, Wp, Cin) f32 (one batch element, already padded)
       w_ref: (D*D, Cin, Cout) bf16   b_ref/a_ref: (1, Cout) f32
       o_ref: (Ho*Wo, Cout) f32       acc_ref: (Ho*Wo, Cout) f32 scratch."""
    for t in range(D * D):
        i, j = divmod(t, D)
        patch = x_ref[i:i + Ho, j:j + Wo, :]                 # (Ho, Wo, Cin) f32
        patch = patch.reshape(Ho * Wo, patch.shape[-1]).astype(jnp.bfloat16)
        contrib = jnp.dot(patch, w_ref[t],                   # bf16 x bf16 on MXU
                          preferred_element_type=jnp.float32)
        if t == 0:
            acc_ref[...] = contrib
        else:
            acc_ref[...] += contrib
    r = acc_ref[...] + b_ref[...]                            # (Ho*Wo, Cout) + (1, Cout)
    o_ref[...] = jnp.where(r >= 0.0, r, r * a_ref[...])      # fused PReLU


def conv_gemm_nhwc(xpad, wk, b, a, D, Ho, Wo):
    """Stride-1 valid conv: out[b,h,w,:] = PReLU(sum_t xpad[b,h+i,w+j,:] @ wk[t] + b).

    xpad: (B, Hp, Wp, Cin) f32 (pre-padded), wk: (D*D, Cin, Cout) bf16,
    b/a: (1, Cout) f32.  Returns (B, Ho, Wo, Cout) f32."""
    B, Hp, Wp, Cin = xpad.shape
    DD, Cin2, Cout = wk.shape
    assert DD == D * D and Cin2 == Cin
    assert Hp >= Ho + D - 1 and Wp >= Wo + D - 1

    kernel = functools.partial(_conv_gemm_kernel, D=D, Ho=Ho, Wo=Wo)
    out = pl.pallas_call(
        kernel,
        out_shape=jax.ShapeDtypeStruct((B, Ho * Wo, Cout), jnp.float32),
        grid_spec=pltpu.PrefetchScalarGridSpec(
            num_scalar_prefetch=0,
            grid=(B,),
            in_specs=[
                pl.BlockSpec((None, Hp, Wp, Cin), lambda bi: (bi, 0, 0, 0)),
                pl.BlockSpec((DD, Cin, Cout), lambda bi: (0, 0, 0)),
                pl.BlockSpec((1, Cout), lambda bi: (0, 0)),
                pl.BlockSpec((1, Cout), lambda bi: (0, 0)),
            ],
            out_specs=pl.BlockSpec((None, Ho * Wo, Cout), lambda bi: (bi, 0, 0)),
            scratch_shapes=[pltpu.VMEM((Ho * Wo, Cout), jnp.float32)],
        ),
        compiler_params=pltpu.CompilerParams(
            dimension_semantics=("parallel",),
            vmem_limit_bytes=64 * 1024 * 1024,
        ),
    )(xpad.astype(jnp.float32), wk, b, a)
    return out.reshape(B, Ho, Wo, Cout)


# ----------------------------------------------------------------------------
# Layout helpers (plain JAX glue, activation-sized only)
# ----------------------------------------------------------------------------
def space_to_depth(x, s):
    B, H, W, C = x.shape
    x = x.reshape(B, H // s, s, W // s, s, C)
    x = x.transpose(0, 1, 3, 2, 4, 5)
    return x.reshape(B, H // s, W // s, s * s * C)


def depth_to_space(x, s):
    B, H, W, C = x.shape
    Co = C // (s * s)
    x = x.reshape(B, H, W, s, s, Co)
    x = x.transpose(0, 1, 3, 2, 4, 5)
    return x.reshape(B, H * s, W * s, Co)


def _deconv_geometry(k, s, p):
    """Sub-pixel decomposition geometry of ConvTranspose2d(k, s, p)."""
    offs_min, offs_max = [], []
    for r in range(s):
        t = (r + p) % s
        q = (r + p) // s
        d_r = -(-(k - t) // s)            # number of valid kernel taps for phase r
        offs_min.append(q - d_r + 1)
        offs_max.append(q)
    off_min, off_max = min(offs_min), max(offs_max)
    assert off_min <= 0 <= off_max
    De = off_max - off_min + 1
    return De, -off_min, off_max, off_min   # De, pad_lo, pad_hi, off_min


# ----------------------------------------------------------------------------
# Weight packing (done once at init time, PyTorch layouts in, kernel layouts out)
# ----------------------------------------------------------------------------
def pack_conv_s1(w_pt, b, alpha, pad_out_to=None):
    """Conv2d weight (O, C, kh, kw) -> (kh*kw, C, O) bf16 (stride-1 conv)."""
    O, C, kh, kw = w_pt.shape
    wk = jnp.transpose(w_pt, (2, 3, 1, 0)).reshape(kh * kw, C, O)
    if pad_out_to is not None and pad_out_to > O:
        extra = pad_out_to - O
        wk = jnp.pad(wk, ((0, 0), (0, 0), (0, extra)))
        b = jnp.pad(b, (0, extra))
        alpha = jnp.pad(alpha, (0, extra), constant_values=1.0)
        O = pad_out_to
    return {"w": wk.astype(jnp.bfloat16),
            "b": b.reshape(1, O).astype(jnp.float32),
            "a": alpha.reshape(1, O).astype(jnp.float32)}


def pack_conv_strided(w_pt, b, alpha, k, s):
    """Conv2d(k, stride=s) weight -> stride-1 kernel over the space-to-depth input."""
    O, C, kh, kw = w_pt.shape
    Kd = -(-k // s)
    pad_k = Kd * s - k
    w = jnp.pad(w_pt, ((0, 0), (0, 0), (0, pad_k), (0, pad_k)))
    w = w.reshape(O, C, Kd, s, Kd, s)
    w = jnp.transpose(w, (2, 4, 3, 5, 1, 0))          # (Kd, Kd, s, s, C, O)
    wk = w.reshape(Kd * Kd, s * s * C, O)
    return {"w": wk.astype(jnp.bfloat16),
            "b": b.reshape(1, O).astype(jnp.float32),
            "a": alpha.reshape(1, O).astype(jnp.float32)}


def pack_deconv(w_pt, b, alpha, k, s, p):
    """ConvTranspose2d weight (Cin, Cout, kh, kw) -> sub-pixel stride-1 kernel
       producing s*s*Cout phase-packed channels (pixel-shuffled afterwards)."""
    Cin, Cout, kh, kw = w_pt.shape
    De, pad_lo, pad_hi, off_min = _deconv_geometry(k, s, p)
    KH = np.full((De, s), k, dtype=np.int32)          # index k -> zero row sentinel
    for r in range(s):
        t = (r + p) % s
        q = (r + p) // s
        for dd in range(De):
            dh = q - (dd + off_min)
            ki = dh * s + t
            if dh >= 0 and ki < k:
                KH[dd, r] = ki
    idx = jnp.asarray(KH.reshape(-1))
    w_hw = jnp.pad(jnp.transpose(w_pt, (2, 3, 0, 1)), ((0, 1), (0, 1), (0, 0), (0, 0)))
    g = jnp.take(w_hw, idx, axis=0).reshape(De, s, kw + 1, Cin, Cout)
    g = jnp.take(g, idx, axis=2).reshape(De, s, De, s, Cin, Cout)
    g = jnp.transpose(g, (0, 2, 4, 1, 3, 5))          # (De, De, Cin, s, s, Cout)
    wk = g.reshape(De * De, Cin, s * s * Cout)
    bb = jnp.tile(b.reshape(1, Cout), (s * s, 1)).reshape(1, s * s * Cout)
    aa = jnp.tile(alpha.reshape(1, Cout), (s * s, 1)).reshape(1, s * s * Cout)
    return {"w": wk.astype(jnp.bfloat16),
            "b": bb.astype(jnp.float32),
            "a": aa.astype(jnp.float32)}


# ----------------------------------------------------------------------------
# Layer wrappers (all end up in the same Pallas kernel)
# ----------------------------------------------------------------------------
def conv2d_s1(x, pk, ksize, pad):
    B, H, W, C = x.shape
    if pad > 0:
        x = jnp.pad(x, ((0, 0), (pad, pad), (pad, pad), (0, 0)))
    Ho = H + 2 * pad - ksize + 1
    Wo = W + 2 * pad - ksize + 1
    return conv_gemm_nhwc(x, pk["w"], pk["b"], pk["a"], ksize, Ho, Wo)


def conv2d_strided(x, pk, k, s, p):
    B, H, W, C = x.shape
    Ho = (H + 2 * p - k) // s + 1
    Wo = (W + 2 * p - k) // s + 1
    Hp, Wp = H + 2 * p, W + 2 * p
    Hp2, Wp2 = -(-Hp // s) * s, -(-Wp // s) * s       # align to stride for phase split
    x = jnp.pad(x, ((0, 0), (p, Hp2 - H - p), (p, Wp2 - W - p), (0, 0)))
    xph = space_to_depth(x, s)
    Kd = -(-k // s)
    return conv_gemm_nhwc(xph, pk["w"], pk["b"], pk["a"], Kd, Ho, Wo)


def deconv2d(x, pk, k, s, p):
    B, H, W, C = x.shape
    assert (H - 1) * s - 2 * p + k == s * H           # holds for all DDBPN configs
    De, pad_lo, pad_hi, _ = _deconv_geometry(k, s, p)
    xp = jnp.pad(x, ((0, 0), (pad_lo, pad_hi), (pad_lo, pad_hi), (0, 0)))
    packed = conv_gemm_nhwc(xp, pk["w"], pk["b"], pk["a"], De, H, W)
    return depth_to_space(packed, s)                  # pixel shuffle


# ----------------------------------------------------------------------------
# Parameter construction (synthetic weights, PyTorch layouts, packed at init)
# ----------------------------------------------------------------------------
class _Gen:
    def __init__(self, key):
        self.key = key

    def next(self):
        self.key, sub = jax.random.split(self.key)
        return sub


def _prelu(c):
    return jnp.full((c,), 0.25, jnp.float32)          # PyTorch PReLU default


def _conv_w(gen, out_c, in_c, kk):
    bound = 1.0 / math.sqrt(in_c * kk * kk)
    w = jax.random.uniform(gen.next(), (out_c, in_c, kk, kk), jnp.float32, -bound, bound)
    b = jax.random.uniform(gen.next(), (out_c,), jnp.float32, -bound, bound)
    return w, b


def _convT_w(gen, in_c, out_c, kk):
    bound = 1.0 / math.sqrt(in_c * kk * kk)
    w = jax.random.uniform(gen.next(), (in_c, out_c, kk, kk), jnp.float32, -bound, bound)
    b = jax.random.uniform(gen.next(), (out_c,), jnp.float32, -bound, bound)
    return w, b


def _make_up(gen, k, s, p, in_c, out_c, bottleneck):
    blk = {}
    if bottleneck:
        w, b = _conv_w(gen, out_c, in_c, 1)
        blk["bneck"] = pack_conv_s1(w, b, _prelu(out_c))
        mid = out_c
    else:
        mid = in_c
    w, b = _convT_w(gen, mid, out_c, k)
    blk["deconv1"] = pack_deconv(w, b, _prelu(out_c), k, s, p)
    w, b = _conv_w(gen, mid, out_c, k)                 # Conv2d(out_c -> mid)
    blk["conv"] = pack_conv_strided(w, b, _prelu(mid), k, s)
    w, b = _convT_w(gen, mid, out_c, k)
    blk["deconv2"] = pack_deconv(w, b, _prelu(out_c), k, s, p)
    return blk


def _make_down(gen, k, s, p, in_c, out_c, bottleneck):
    blk = {}
    if bottleneck:
        w, b = _conv_w(gen, out_c, in_c, 1)
        blk["bneck"] = pack_conv_s1(w, b, _prelu(out_c))
        mid = out_c
    else:
        mid = in_c
    w, b = _conv_w(gen, out_c, mid, k)                 # Conv2d(mid -> out_c)
    blk["conv1"] = pack_conv_strided(w, b, _prelu(out_c), k, s)
    w, b = _convT_w(gen, out_c, mid, k)                # ConvT(out_c -> mid)
    blk["deconv"] = pack_deconv(w, b, _prelu(mid), k, s, p)
    w, b = _conv_w(gen, out_c, mid, k)
    blk["conv2"] = pack_conv_strided(w, b, _prelu(out_c), k, s)
    return blk


def init_ddbpn(key, scale_factor):
    k, s, p = {2: (6, 2, 2), 4: (8, 4, 2), 8: (12, 8, 2)}[scale_factor]
    gen = _Gen(key)
    P = {}
    w, b = _conv_w(gen, 256, 3, 3)
    P["init1"] = pack_conv_s1(w, b, _prelu(256))
    w, b = _conv_w(gen, 64, 256, 1)
    P["init2"] = pack_conv_s1(w, b, _prelu(64))
    P["up1"] = _make_up(gen, k, s, p, 64, 64, False)
    P["down1"] = _make_down(gen, k, s, p, 64, 64, False)
    P["up2"] = _make_up(gen, k, s, p, 64, 64, False)
    P["down2"] = _make_down(gen, k, s, p, 128, 64, True)
    P["up3"] = _make_up(gen, k, s, p, 128, 64, True)
    P["down3"] = _make_down(gen, k, s, p, 192, 64, True)
    P["up4"] = _make_up(gen, k, s, p, 192, 64, True)
    P["down4"] = _make_down(gen, k, s, p, 256, 64, True)
    P["up5"] = _make_up(gen, k, s, p, 256, 64, True)
    P["down5"] = _make_down(gen, k, s, p, 320, 64, True)
    P["up6"] = _make_up(gen, k, s, p, 320, 64, True)
    P["down6"] = _make_down(gen, k, s, p, 384, 64, True)
    P["up7"] = _make_up(gen, k, s, p, 384, 64, True)
    w, b = _conv_w(gen, 3, 448, 3)
    # final conv has no PReLU -> alpha = 1; pad N=3 -> 128 lanes, sliced after.
    P["final"] = pack_conv_s1(w, b, jnp.ones((3,), jnp.float32), pad_out_to=128)
    return P, (k, s, p)


# ----------------------------------------------------------------------------
# Projection blocks and full network forward (NHWC, channel concat on lanes)
# ----------------------------------------------------------------------------
def up_projection(blk, x, k, s, p):
    if "bneck" in blk:
        x = conv2d_s1(x, blk["bneck"], 1, 0)
    h0 = deconv2d(x, blk["deconv1"], k, s, p)
    l0 = conv2d_strided(h0, blk["conv"], k, s, p)
    h1 = deconv2d(l0 - x, blk["deconv2"], k, s, p)
    return h0 + h1


def down_projection(blk, x, k, s, p):
    if "bneck" in blk:
        x = conv2d_s1(x, blk["bneck"], 1, 0)
    l0 = conv2d_strided(x, blk["conv1"], k, s, p)
    h0 = deconv2d(l0, blk["deconv"], k, s, p)
    l1 = conv2d_strided(h0 - x, blk["conv2"], k, s, p)
    return l0 + l1


def ddbpn_forward(P, x_nchw, *, cfg):
    k, s, p = cfg
    x = jnp.transpose(x_nchw, (0, 2, 3, 1))           # single NCHW -> NHWC transpose
    x = conv2d_s1(x, P["init1"], 3, 1)
    x = conv2d_s1(x, P["init2"], 1, 0)
    cat = lambda ts: jnp.concatenate(ts, axis=-1)     # channel concat on lane dim

    H1 = up_projection(P["up1"], x, k, s, p)
    L1 = down_projection(P["down1"], H1, k, s, p)
    H2 = up_projection(P["up2"], L1, k, s, p)
    L2 = down_projection(P["down2"], cat((H1, H2)), k, s, p)
    H3 = up_projection(P["up3"], cat((L1, L2)), k, s, p)
    L3 = down_projection(P["down3"], cat((H1, H2, H3)), k, s, p)
    H4 = up_projection(P["up4"], cat((L1, L2, L3)), k, s, p)
    L4 = down_projection(P["down4"], cat((H1, H2, H3, H4)), k, s, p)
    H5 = up_projection(P["up5"], cat((L1, L2, L3, L4)), k, s, p)
    L5 = down_projection(P["down5"], cat((H1, H2, H3, H4, H5)), k, s, p)
    H6 = up_projection(P["up6"], cat((L1, L2, L3, L4, L5)), k, s, p)
    L6 = down_projection(P["down6"], cat((H1, H2, H3, H4, H5, H6)), k, s, p)
    H7 = up_projection(P["up7"], cat((L1, L2, L3, L4, L5, L6)), k, s, p)

    H = cat((H1, H2, H3, H4, H5, H6, H7))
    y = conv2d_s1(H, P["final"], 3, 1)[..., :3]       # drop lane padding
    return jnp.transpose(y, (0, 3, 1, 2))             # back to NCHW


# ----------------------------------------------------------------------------
# Small XLA references (verification only; operands pre-rounded to bf16)
# ----------------------------------------------------------------------------
def _reference_conv(x_nhwc, w_pt, b, alpha, stride, pad):
    xq = x_nhwc.astype(jnp.bfloat16).astype(jnp.float32)
    wq = w_pt.astype(jnp.bfloat16).astype(jnp.float32)
    w_hwio = jnp.transpose(wq, (2, 3, 1, 0))
    y = lax.conv_general_dilated(
        xq, w_hwio, window_strides=(stride, stride),
        padding=[(pad, pad), (pad, pad)],
        dimension_numbers=("NHWC", "HWIO", "NHWC"),
        precision=lax.Precision.HIGHEST)
    y = y + b.reshape(1, 1, 1, -1)
    return jnp.where(y >= 0, y, y * alpha.reshape(1, 1, 1, -1))


def _reference_deconv(x_nhwc, w_pt, b, alpha, k, stride, pad):
    xq = x_nhwc.astype(jnp.bfloat16).astype(jnp.float32)
    wq = w_pt.astype(jnp.bfloat16).astype(jnp.float32)
    w_hwio = jnp.transpose(jnp.flip(wq, (2, 3)), (2, 3, 0, 1))
    y = lax.conv_general_dilated(
        xq, w_hwio, window_strides=(1, 1),
        padding=[(k - 1 - pad, k - 1 - pad)] * 2,
        lhs_dilation=(stride, stride),
        dimension_numbers=("NHWC", "HWIO", "NHWC"),
        precision=lax.Precision.HIGHEST)
    y = y + b.reshape(1, 1, 1, -1)
    return jnp.where(y >= 0, y, y * alpha.reshape(1, 1, 1, -1))


# ----------------------------------------------------------------------------
if __name__ == "__main__":
    scale_factor = 2
    k, s, p = {2: (6, 2, 2), 4: (8, 4, 2), 8: (12, 8, 2)}[scale_factor]

    # --- correctness checks of the strided-conv / sub-pixel deconv lowering ---
    ks_ = jax.random.split(jax.random.PRNGKey(1), 6)
    xt = jax.random.normal(ks_[0], (2, 8, 8, 16), jnp.float32)
    wt = jax.random.normal(ks_[1], (24, 16, k, k), jnp.float32) * 0.1
    bt = jax.random.normal(ks_[2], (24,), jnp.float32) * 0.1
    at = jnp.full((24,), 0.25, jnp.float32)
    got = conv2d_strided(xt, pack_conv_strided(wt, bt, at, k, s), k, s, p)
    ref = _reference_conv(xt, wt, bt, at, s, p)
    err = float(jnp.max(jnp.abs(got - ref)))
    assert got.shape == ref.shape and err < 5e-3, f"strided-conv check failed: {err}"

    wtt = jax.random.normal(ks_[3], (16, 24, k, k), jnp.float32) * 0.1
    btt = jax.random.normal(ks_[4], (24,), jnp.float32) * 0.1
    got = deconv2d(xt, pack_deconv(wtt, btt, at, k, s, p), k, s, p)
    ref = _reference_deconv(xt, wtt, btt, at, k, s, p)
    err = float(jnp.max(jnp.abs(got - ref)))
    assert got.shape == ref.shape and err < 5e-3, f"deconv check failed: {err}"

    w3 = jax.random.normal(ks_[5], (32, 16, 3, 3), jnp.float32) * 0.1
    b3 = jnp.zeros((32,), jnp.float32)
    a3 = jnp.full((32,), 0.25, jnp.float32)
    got = conv2d_s1(xt, pack_conv_s1(w3, b3, a3), 3, 1)
    ref = _reference_conv(xt, w3, b3, a3, 1, 1)
    err = float(jnp.max(jnp.abs(got - ref)))
    assert got.shape == ref.shape and err < 5e-3, f"conv3x3 check failed: {err}"

    # --- full DDBPN forward ---------------------------------------------------
    params, cfg = init_ddbpn(jax.random.PRNGKey(42), scale_factor)
    x = jax.random.normal(jax.random.PRNGKey(0), (2, 3, 8, 8), jnp.float32)

    fwd = jax.jit(functools.partial(ddbpn_forward, cfg=cfg))
    out = jax.block_until_ready(fwd(params, x))

    expected = (2, 3, 8 * scale_factor, 8 * scale_factor)
    assert out.shape == expected, f"bad output shape {out.shape} != {expected}"
    assert bool(jnp.all(jnp.isfinite(out))), "non-finite output"
    print("KERNEL_OK")
</pallas_src>

<mosaic_0001>
module attributes {stable_mosaic.version = 11 : i64} {
  func.func @_conv_gemm_kernel(%arg0: i32, %arg1: memref<1x6x6x64xf32, #tpu.memory_space<vmem>>, %arg2: memref<9x64x24xbf16, #tpu.memory_space<vmem>>, %arg3: memref<1x24xf32, #tpu.memory_space<vmem>>, %arg4: memref<1x24xf32, #tpu.memory_space<vmem>>, %arg5: memref<1x16x24xf32, #tpu.memory_space<vmem>>, %arg6: memref<16x24xf32, #tpu.memory_space<vmem>>) attributes {dimension_semantics = [#tpu.dimension_semantics<parallel>], iteration_bounds = array<i64: 2>, scalar_prefetch = 0 : i64, scratch_operands = 1 : i64, tpu.core_type = #tpu.core_type<tc>, window_params = [{transform_indices = @transform_0, window_bounds = array<i64: 1, 6, 6, 64>}, {pipeline_mode = #tpu.pipeline_mode<synchronous>, transform_indices = @transform_1, window_bounds = array<i64: 9, 64, 24>}, {pipeline_mode = #tpu.pipeline_mode<synchronous>, transform_indices = @transform_2, window_bounds = array<i64: 1, 24>}, {pipeline_mode = #tpu.pipeline_mode<synchronous>, transform_indices = @transform_3, window_bounds = array<i64: 1, 24>}, {transform_indices = @transform_4, window_bounds = array<i64: 1, 16, 24>}]} {
    %c0 = arith.constant 0 : index
    %c0_0 = arith.constant 0 : index
    %c0_1 = arith.constant 0 : index
    %c0_2 = arith.constant 0 : index
    %0 = vector.load %arg1[%c0, %c0_0, %c0_1, %c0_2] : memref<1x6x6x64xf32, #tpu.memory_space<vmem>>, vector<1x4x4x64xf32>
    %1 = vector.shape_cast %0 : vector<1x4x4x64xf32> to vector<4x4x64xf32>
    %2 = vector.shape_cast %1 : vector<4x4x64xf32> to vector<16x64xf32>
    %3 = arith.truncf %2 : vector<16x64xf32> to vector<16x64xbf16>
    %c0_3 = arith.constant 0 : index
    %c0_4 = arith.constant 0 : index
    %c0_5 = arith.constant 0 : index
    %4 = vector.load %arg2[%c0_3, %c0_4, %c0_5] : memref<9x64x24xbf16, #tpu.memory_space<vmem>>, vector<1x64x24xbf16>
    %5 = vector.shape_cast %4 : vector<1x64x24xbf16> to vector<64x24xbf16>
    %cst = arith.constant dense<0.000000e+00> : vector<16x24xf32>
    %6 = tpu.matmul %3, %5, %cst {dimension_numbers = #tpu.dot_dimension_numbers<[1], [0], [0], [1], [0, 0, 1, 1], [], []>} : vector<16x64xbf16>, vector<64x24xbf16>, vector<16x24xf32> -> vector<16x24xf32>
    %c0_6 = arith.constant 0 : index
    %c0_7 = arith.constant 0 : index
    %7 = vector.load %arg6[%c0_6, %c0_7] : memref<16x24xf32, #tpu.memory_space<vmem>>, vector<16x24xf32>
    tpu.vector_store %arg6[%c0_6, %c0_7], %6 {strides = array<i32>} : memref<16x24xf32, #tpu.memory_space<vmem>>, vector<16x24xf32>,
    %c0_8 = arith.constant 0 : index
    %c0_9 = arith.constant 0 : index
    %c1 = arith.constant 1 : index
    %c0_10 = arith.constant 0 : index
    %8 = vector.load %arg1[%c0_8, %c0_9, %c1, %c0_10] : memref<1x6x6x64xf32, #tpu.memory_space<vmem>>, vector<1x4x4x64xf32>
    %9 = vector.shape_cast %8 : vector<1x4x4x64xf32> to vector<4x4x64xf32>
    %10 = vector.shape_cast %9 : vector<4x4x64xf32> to vector<16x64xf32>
    %11 = arith.truncf %10 : vector<16x64xf32> to vector<16x64xbf16>
    %c1_11 = arith.constant 1 : index
    %c0_12 = arith.constant 0 : index
    %c0_13 = arith.constant 0 : index
    %12 = vector.load %arg2[%c1_11, %c0_12, %c0_13] : memref<9x64x24xbf16, #tpu.memory_space<vmem>>, vector<1x64x24xbf16>
    %13 = vector.shape_cast %12 : vector<1x64x24xbf16> to vector<64x24xbf16>
    %cst_14 = arith.constant dense<0.000000e+00> : vector<16x24xf32>
    %14 = tpu.matmul %11, %13, %cst_14 {dimension_numbers = #tpu.dot_dimension_numbers<[1], [0], [0], [1], [0, 0, 1, 1], [], []>} : vector<16x64xbf16>, vector<64x24xbf16>, vector<16x24xf32> -> vector<16x24xf32>
    %c0_15 = arith.constant 0 : index
    %c0_16 = arith.constant 0 : index
    %15 = vector.load %arg6[%c0_15, %c0_16] : memref<16x24xf32, #tpu.memory_space<vmem>>, vector<16x24xf32>
    %16 = arith.addf %15, %14 : vector<16x24xf32>
    %c0_17 = arith.constant 0 : index
    %c0_18 = arith.constant 0 : index
    %17 = vector.load %arg6[%c0_17, %c0_18] : memref<16x24xf32, #tpu.memory_space<vmem>>, vector<16x24xf32>
    tpu.vector_store %arg6[%c0_17, %c0_18], %16 {strides = array<i32>} : memref<16x24xf32, #tpu.memory_space<vmem>>, vector<16x24xf32>,
    %c0_19 = arith.constant 0 : index
    %c0_20 = arith.constant 0 : index
    %c2 = arith.constant 2 : index
    %c0_21 = arith.constant 0 : index
    %18 = vector.load %arg1[%c0_19, %c0_20, %c2, %c0_21] : memref<1x6x6x64xf32, #tpu.memory_space<vmem>>, vector<1x4x4x64xf32>
    %19 = vector.shape_cast %18 : vector<1x4x4x64xf32> to vector<4x4x64xf32>
    %20 = vector.shape_cast %19 : vector<4x4x64xf32> to vector<16x64xf32>
    %21 = arith.truncf %20 : vector<16x64xf32> to vector<16x64xbf16>
    %c2_22 = arith.constant 2 : index
    %c0_23 = arith.constant 0 : index
    %c0_24 = arith.constant 0 : index
    %22 = vector.load %arg2[%c2_22, %c0_23, %c0_24] : memref<9x64x24xbf16, #tpu.memory_space<vmem>>, vector<1x64x24xbf16>
    %23 = vector.shape_cast %22 : vector<1x64x24xbf16> to vector<64x24xbf16>
    %cst_25 = arith.constant dense<0.000000e+00> : vector<16x24xf32>
    %24 = tpu.matmul %21, %23, %cst_25 {dimension_numbers = #tpu.dot_dimension_numbers<[1], [0], [0], [1], [0, 0, 1, 1], [], []>} : vector<16x64xbf16>, vector<64x24xbf16>, vector<16x24xf32> -> vector<16x24xf32>
    %c0_26 = arith.constant 0 : index
    %c0_27 = arith.constant 0 : index
    %25 = vector.load %arg6[%c0_26, %c0_27] : memref<16x24xf32, #tpu.memory_space<vmem>>, vector<16x24xf32>
    %26 = arith.addf %25, %24 : vector<16x24xf32>
    %c0_28 = arith.constant 0 : index
    %c0_29 = arith.constant 0 : index
    %27 = vector.load %arg6[%c0_28, %c0_29] : memref<16x24xf32, #tpu.memory_space<vmem>>, vector<16x24xf32>
    tpu.vector_store %arg6[%c0_28, %c0_29], %26 {strides = array<i32>} : memref<16x24xf32, #tpu.memory_space<vmem>>, vector<16x24xf32>,
    %c0_30 = arith.constant 0 : index
    %c1_31 = arith.constant 1 : index
    %c0_32 = arith.constant 0 : index
    %c0_33 = arith.constant 0 : index
    %28 = vector.load %arg1[%c0_30, %c1_31, %c0_32, %c0_33] : memref<1x6x6x64xf32, #tpu.memory_space<vmem>>, vector<1x4x4x64xf32>
    %29 = vector.shape_cast %28 : vector<1x4x4x64xf32> to vector<4x4x64xf32>
    %30 = vector.shape_cast %29 : vector<4x4x64xf32> to vector<16x64xf32>
    %31 = arith.truncf %30 : vector<16x64xf32> to vector<16x64xbf16>
    %c3 = arith.constant 3 : index
    %c0_34 = arith.constant 0 : index
    %c0_35 = arith.constant 0 : index
    %32 = vector.load %arg2[%c3, %c0_34, %c0_35] : memref<9x64x24xbf16, #tpu.memory_space<vmem>>, vector<1x64x24xbf16>
    %33 = vector.shape_cast %32 : vector<1x64x24xbf16> to vector<64x24xbf16>
    %cst_36 = arith.constant dense<0.000000e+00> : vector<16x24xf32>
    %34 = tpu.matmul %31, %33, %cst_36 {dimension_numbers = #tpu.dot_dimension_numbers<[1], [0], [0], [1], [0, 0, 1, 1], [], []>} : vector<16x64xbf16>, vector<64x24xbf16>, vector<16x24xf32> -> vector<16x24xf32>
    %c0_37 = arith.constant 0 : index
    %c0_38 = arith.constant 0 : index
    %35 = vector.load %arg6[%c0_37, %c0_38] : memref<16x24xf32, #tpu.memory_space<vmem>>, vector<16x24xf32>
    %36 = arith.addf %35, %34 : vector<16x24xf32>
    %c0_39 = arith.constant 0 : index
    %c0_40 = arith.constant 0 : index
    %37 = vector.load %arg6[%c0_39, %c0_40] : memref<16x24xf32, #tpu.memory_space<vmem>>, vector<16x24xf32>
    tpu.vector_store %arg6[%c0_39, %c0_40], %36 {strides = array<i32>} : memref<16x24xf32, #tpu.memory_space<vmem>>, vector<16x24xf32>,
    %c0_41 = arith.constant 0 : index
    %c1_42 = arith.constant 1 : index
    %c1_43 = arith.constant 1 : index
    %c0_44 = arith.constant 0 : index
    %38 = vector.load %arg1[%c0_41, %c1_42, %c1_43, %c0_44] : memref<1x6x6x64xf32, #tpu.memory_space<vmem>>, vector<1x4x4x64xf32>
    %39 = vector.shape_cast %38 : vector<1x4x4x64xf32> to vector<4x4x64xf32>
    %40 = vector.shape_cast %39 : vector<4x4x64xf32> to vector<16x64xf32>
    %41 = arith.truncf %40 : vector<16x64xf32> to vector<16x64xbf16>
    %c4 = arith.constant 4 : index
    %c0_45 = arith.constant 0 : index
    %c0_46 = arith.constant 0 : index
    %42 = vector.load %arg2[%c4, %c0_45, %c0_46] : memref<9x64x24xbf16, #tpu.memory_space<vmem>>, vector<1x64x24xbf16>
    %43 = vector.shape_cast %42 : vector<1x64x24xbf16> to vector<64x24xbf16>
    %cst_47 = arith.constant dense<0.000000e+00> : vector<16x24xf32>
    %44 = tpu.matmul %41, %43, %cst_47 {dimension_numbers = #tpu.dot_dimension_numbers<[1], [0], [0], [1], [0, 0, 1, 1], [], []>} : vector<16x64xbf16>, vector<64x24xbf16>, vector<16x24xf32> -> vector<16x24xf32>
    %c0_48 = arith.constant 0 : index
    %c0_49 = arith.constant 0 : index
    %45 = vector.load %arg6[%c0_48, %c0_49] : memref<16x24xf32, #tpu.memory_space<vmem>>, vector<16x24xf32>
    %46 = arith.addf %45, %44 : vector<16x24xf32>
    %c0_50 = arith.constant 0 : index
    %c0_51 = arith.constant 0 : index
    %47 = vector.load %arg6[%c0_50, %c0_51] : memref<16x24xf32, #tpu.memory_space<vmem>>, vector<16x24xf32>
    tpu.vector_store %arg6[%c0_50, %c0_51], %46 {strides = array<i32>} : memref<16x24xf32, #tpu.memory_space<vmem>>, vector<16x24xf32>,
    %c0_52 = arith.constant 0 : index
    %c1_53 = arith.constant 1 : index
    %c2_54 = arith.constant 2 : index
    %c0_55 = arith.constant 0 : index
    %48 = vector.load %arg1[%c0_52, %c1_53, %c2_54, %c0_55] : memref<1x6x6x64xf32, #tpu.memory_space<vmem>>, vector<1x4x4x64xf32>
    %49 = vector.shape_cast %48 : vector<1x4x4x64xf32> to vector<4x4x64xf32>
    %50 = vector.shape_cast %49 : vector<4x4x64xf32> to vector<16x64xf32>
    %51 = arith.truncf %50 : vector<16x64xf32> to vector<16x64xbf16>
    %c5 = arith.constant 5 : index
    %c0_56 = arith.constant 0 : index
    %c0_57 = arith.constant 0 : index
    %52 = vector.load %arg2[%c5, %c0_56, %c0_57] : memref<9x64x24xbf16, #tpu.memory_space<vmem>>, vector<1x64x24xbf16>
    %53 = vector.shape_cast %52 : vector<1x64x24xbf16> to vector<64x24xbf16>
    %cst_58 = arith.constant dense<0.000000e+00> : vector<16x24xf32>
    %54 = tpu.matmul %51, %53, %cst_58 {dimension_numbers = #tpu.dot_dimension_numbers<[1], [0], [0], [1], [0, 0, 1, 1], [], []>} : vector<16x64xbf16>, vector<64x24xbf16>, vector<16x24xf32> -> vector<16x24xf32>
    %c0_59 = arith.constant 0 : index
    %c0_60 = arith.constant 0 : index
    %55 = vector.load %arg6[%c0_59, %c0_60] : memref<16x24xf32, #tpu.memory_space<vmem>>, vector<16x24xf32>
    %56 = arith.addf %55, %54 : vector<16x24xf32>
    %c0_61 = arith.constant 0 : index
    %c0_62 = arith.constant 0 : index
    %57 = vector.load %arg6[%c0_61, %c0_62] : memref<16x24xf32, #tpu.memory_space<vmem>>, vector<16x24xf32>
    tpu.vector_store %arg6[%c0_61, %c0_62], %56 {strides = array<i32>} : memref<16x24xf32, #tpu.memory_space<vmem>>, vector<16x24xf32>,
    %c0_63 = arith.constant 0 : index
    %c2_64 = arith.constant 2 : index
    %c0_65 = arith.constant 0 : index
    %c0_66 = arith.constant 0 : index
    %58 = vector.load %arg1[%c0_63, %c2_64, %c0_65, %c0_66] : memref<1x6x6x64xf32, #tpu.memory_space<vmem>>, vector<1x4x4x64xf32>
    %59 = vector.shape_cast %58 : vector<1x4x4x64xf32> to vector<4x4x64xf32>
    %60 = vector.shape_cast %59 : vector<4x4x64xf32> to vector<16x64xf32>
    %61 = arith.truncf %60 : vector<16x64xf32> to vector<16x64xbf16>
    %c6 = arith.constant 6 : index
    %c0_67 = arith.constant 0 : index
    %c0_68 = arith.constant 0 : index
    %62 = vector.load %arg2[%c6, %c0_67, %c0_68] : memref<9x64x24xbf16, #tpu.memory_space<vmem>>, vector<1x64x24xbf16>
    %63 = vector.shape_cast %62 : vector<1x64x24xbf16> to vector<64x24xbf16>
    %cst_69 = arith.constant dense<0.000000e+00> : vector<16x24xf32>
    %64 = tpu.matmul %61, %63, %cst_69 {dimension_numbers = #tpu.dot_dimension_numbers<[1], [0], [0], [1], [0, 0, 1, 1], [], []>} : vector<16x64xbf16>, vector<64x24xbf16>, vector<16x24xf32> -> vector<16x24xf32>
    %c0_70 = arith.constant 0 : index
    %c0_71 = arith.constant 0 : index
    %65 = vector.load %arg6[%c0_70, %c0_71] : memref<16x24xf32, #tpu.memory_space<vmem>>, vector<16x24xf32>
    %66 = arith.addf %65, %64 : vector<16x24xf32>
    %c0_72 = arith.constant 0 : index
    %c0_73 = arith.constant 0 : index
    %67 = vector.load %arg6[%c0_72, %c0_73] : memref<16x24xf32, #tpu.memory_space<vmem>>, vector<16x24xf32>
    tpu.vector_store %arg6[%c0_72, %c0_73], %66 {strides = array<i32>} : memref<16x24xf32, #tpu.memory_space<vmem>>, vector<16x24xf32>,
    %c0_74 = arith.constant 0 : index
    %c2_75 = arith.constant 2 : index
    %c1_76 = arith.constant 1 : index
    %c0_77 = arith.constant 0 : index
    %68 = vector.load %arg1[%c0_74, %c2_75, %c1_76, %c0_77] : memref<1x6x6x64xf32, #tpu.memory_space<vmem>>, vector<1x4x4x64xf32>
    %69 = vector.shape_cast %68 : vector<1x4x4x64xf32> to vector<4x4x64xf32>
    %70 = vector.shape_cast %69 : vector<4x4x64xf32> to vector<16x64xf32>
    %71 = arith.truncf %70 : vector<16x64xf32> to vector<16x64xbf16>
    %c7 = arith.constant 7 : index
    %c0_78 = arith.constant 0 : index
    %c0_79 = arith.constant 0 : index
    %72 = vector.load %arg2[%c7, %c0_78, %c0_79] : memref<9x64x24xbf16, #tpu.memory_space<vmem>>, vector<1x64x24xbf16>
    %73 = vector.shape_cast %72 : vector<1x64x24xbf16> to vector<64x24xbf16>
    %cst_80 = arith.constant dense<0.000000e+00> : vector<16x24xf32>
    %74 = tpu.matmul %71, %73, %cst_80 {dimension_numbers = #tpu.dot_dimension_numbers<[1], [0], [0], [1], [0, 0, 1, 1], [], []>} : vector<16x64xbf16>, vector<64x24xbf16>, vector<16x24xf32> -> vector<16x24xf32>
    %c0_81 = arith.constant 0 : index
    %c0_82 = arith.constant 0 : index
    %75 = vector.load %arg6[%c0_81, %c0_82] : memref<16x24xf32, #tpu.memory_space<vmem>>, vector<16x24xf32>
    %76 = arith.addf %75, %74 : vector<16x24xf32>
    %c0_83 = arith.constant 0 : index
    %c0_84 = arith.constant 0 : index
    %77 = vector.load %arg6[%c0_83, %c0_84] : memref<16x24xf32, #tpu.memory_space<vmem>>, vector<16x24xf32>
    tpu.vector_store %arg6[%c0_83, %c0_84], %76 {strides = array<i32>} : memref<16x24xf32, #tpu.memory_space<vmem>>, vector<16x24xf32>,
    %c0_85 = arith.constant 0 : index
    %c2_86 = arith.constant 2 : index
    %c2_87 = arith.constant 2 : index
    %c0_88 = arith.constant 0 : index
    %78 = vector.load %arg1[%c0_85, %c2_86, %c2_87, %c0_88] : memref<1x6x6x64xf32, #tpu.memory_space<vmem>>, vector<1x4x4x64xf32>
    %79 = vector.shape_cast %78 : vector<1x4x4x64xf32> to vector<4x4x64xf32>
    %80 = vector.shape_cast %79 : vector<4x4x64xf32> to vector<16x64xf32>
    %81 = arith.truncf %80 : vector<16x64xf32> to vector<16x64xbf16>
    %c8 = arith.constant 8 : index
    %c0_89 = arith.constant 0 : index
    %c0_90 = arith.constant 0 : index
    %82 = vector.load %arg2[%c8, %c0_89, %c0_90] : memref<9x64x24xbf16, #tpu.memory_space<vmem>>, vector<1x64x24xbf16>
    %83 = vector.shape_cast %82 : vector<1x64x24xbf16> to vector<64x24xbf16>
    %cst_91 = arith.constant dense<0.000000e+00> : vector<16x24xf32>
    %84 = tpu.matmul %81, %83, %cst_91 {dimension_numbers = #tpu.dot_dimension_numbers<[1], [0], [0], [1], [0, 0, 1, 1], [], []>} : vector<16x64xbf16>, vector<64x24xbf16>, vector<16x24xf32> -> vector<16x24xf32>
    %c0_92 = arith.constant 0 : index
    %c0_93 = arith.constant 0 : index
    %85 = vector.load %arg6[%c0_92, %c0_93] : memref<16x24xf32, #tpu.memory_space<vmem>>, vector<16x24xf32>
    %86 = arith.addf %85, %84 : vector<16x24xf32>
    %c0_94 = arith.constant 0 : index
    %c0_95 = arith.constant 0 : index
    %87 = vector.load %arg6[%c0_94, %c0_95] : memref<16x24xf32, #tpu.memory_space<vmem>>, vector<16x24xf32>
    tpu.vector_store %arg6[%c0_94, %c0_95], %86 {strides = array<i32>} : memref<16x24xf32, #tpu.memory_space<vmem>>, vector<16x24xf32>,
    %c0_96 = arith.constant 0 : index
    %c0_97 = arith.constant 0 : index
    %88 = vector.load %arg6[%c0_96, %c0_97] : memref<16x24xf32, #tpu.memory_space<vmem>>, vector<16x24xf32>
    %c0_98 = arith.constant 0 : index
    %c0_99 = arith.constant 0 : index
    %89 = vector.load %arg3[%c0_98, %c0_99] : memref<1x24xf32, #tpu.memory_space<vmem>>, vector<1x24xf32>
    %90 = vector.broadcast %89 : vector<1x24xf32> to vector<16x24xf32>
    %91 = arith.addf %88, %90 : vector<16x24xf32>
    %cst_100 = arith.constant 0.000000e+00 : f32
    %92 = vector.broadcast %cst_100 : f32 to vector<16x24xf32>
    %93 = arith.cmpf oge, %91, %92 : vector<16x24xf32>
    %c0_101 = arith.constant 0 : index
    %c0_102 = arith.constant 0 : index
    %94 = vector.load %arg4[%c0_101, %c0_102] : memref<1x24xf32, #tpu.memory_space<vmem>>, vector<1x24xf32>
    %95 = vector.broadcast %94 : vector<1x24xf32> to vector<16x24xf32>
    %96 = arith.mulf %91, %95 : vector<16x24xf32>
    %97 = arith.select %93, %91, %96 : vector<16x24xi1>, vector<16x24xf32>
    %c0_103 = arith.constant 0 : index
    %c0_104 = arith.constant 0 : index
    %c0_105 = arith.constant 0 : index
    %98 = vector.load %arg5[%c0_103, %c0_104, %c0_105] : memref<1x16x24xf32, #tpu.memory_space<vmem>>, vector<1x16x24xf32>
    %99 = vector.shape_cast %98 : vector<1x16x24xf32> to vector<16x24xf32>
    %100 = vector.shape_cast %97 : vector<16x24xf32> to vector<1x16x24xf32>
    tpu.vector_store %arg5[%c0_103, %c0_104, %c0_105], %100 {strides = array<i32>} : memref<1x16x24xf32, #tpu.memory_space<vmem>>, vector<1x16x24xf32>,
    return
  }
  func.func @transform_0(%arg0: i32) -> (i32, i32, i32, i32) {
    %c0_i32 = arith.constant 0 : i32
    %c0_i32_0 = arith.constant 0 : i32
    %c0_i32_1 = arith.constant 0 : i32
    %c0_i32_2 = arith.constant 0 : i32
    return %arg0, %c0_i32, %c0_i32_0, %c0_i32_1 : i32, i32, i32, i32
  }
  func.func @transform_1(%arg0: i32) -> (i32, i32, i32) {
    %c0_i32 = arith.constant 0 : i32
    %c0_i32_0 = arith.constant 0 : i32
    %c0_i32_1 = arith.constant 0 : i32
    %c0_i32_2 = arith.constant 0 : i32
    return %c0_i32, %c0_i32_0, %c0_i32_1 : i32, i32, i32
  }
  func.func @transform_2(%arg0: i32) -> (i32, i32) {
    %c0_i32 = arith.constant 0 : i32
    %c0_i32_0 = arith.constant 0 : i32
    %c0_i32_1 = arith.constant 0 : i32
    return %c0_i32, %c0_i32_0 : i32, i32
  }
  func.func @transform_3(%arg0: i32) -> (i32, i32) {
    %c0_i32 = arith.constant 0 : i32
    %c0_i32_0 = arith.constant 0 : i32
    %c0_i32_1 = arith.constant 0 : i32
    return %c0_i32, %c0_i32_0 : i32, i32
  }
  func.func @transform_4(%arg0: i32) -> (i32, i32, i32) {
    %c0_i32 = arith.constant 0 : i32
    %c0_i32_0 = arith.constant 0 : i32
    %c0_i32_1 = arith.constant 0 : i32
    return %arg0, %c0_i32, %c0_i32_0 : i32, i32, i32
  }
}

</mosaic_0001>

<bundles_post_ra>
// kernel: tpu_custom_call.1
= control target key start
LH: loop header
LB: loop body
LE: loop exit
PB: predicated region body
PF: predicated region fallthrough
CT: control target
= control target key end

     0   :  { %9 = vsyncpa [#allocation4], 0  ;;  %s2238_s0 = inlined_call_operand.hbm [shape: f32[2,6,6,64], index: 0, kind: input, shape index: {}]   ;;  %s2239_s1 = inlined_call_operand.hbm [shape: bf16[9,64,24], index: 1, kind: input, shape index: {}]   ;;  %s2240_s2 = inlined_call_operand.hbm [shape: f32[1,24], index: 2, kind: input, shape index: {}]   ;;  %s2241_s3 = inlined_call_operand.hbm [shape: f32[1,24], index: 3, kind: input, shape index: {}]   ;;  %s2242_s4 = inlined_call_operand.hbm [shape: f32[2,16,24], index: 4, kind: output, shape index: {}]  }
   0x1   :  { %11 = vsyncpa [#allocation4 + $0x1], 0 }
   0x2   :  { %12 = vsyncpa [#allocation7], 0 }
   0x3   :  { %13 = vsyncpa [#allocation10], 0 }
   0x4   :  { %14 = vsyncpa [#allocation5], 0 }
   0x5   :  { %16 = vsyncpa [#allocation5 + $0x1], 0  ;;  %s1874_s15 = smov 0   ;;  %s1876_s16 = smov 0  }
   0x6   :  { %s1878_s17 = smov 0   ;;  %s1880_s18 = smov 0  }
   0x7 LB: > { %s1895_s19 = sadd.s32 4294967295, %s1834_s18   ;;  %s1262_s20 = sadd.s32 4294967294, %s1834_s18   ;;  %s1834_s18 = sphi %s1880_s18, %s2265_s18   ;;  %s1830_s17 = sphi %s1878_s17, %s2264_s17   ;;  %s1826_s16 = sphi %s1876_s16, %s2263_s16   ;;  %s1822_s15 = sphi %s1874_s15, %s2262_s15  }
   0x8   : > { %p42_p0 = scmp.ne.s32.totalorder %s1826_s16, %s1822_s15  ;;  %p2243_p1 = scmp.eq.s32.totalorder %s1895_s19, 0 }
   0x9   : > { %p135_p3 = scmp.eq.s32.totalorder %s1262_s20, 1  ;;  %p1263_p5 = scmp.ge.s32.totalorder %s1834_s18, 1 }
   0xa   : > { %p1904_p4 = por %p2243_p1, %p42_p0  ;;  %p142_p7 = scmp.lt.s32.totalorder %s1834_s18, 3 }
   0xb   : > { %p1909_p6 = por %p135_p3, %p42_p0  ;;  %s1836_s24 = smov [#allocation6]  }
   0xc   : > { %s2246_s21 = scalar_select %p1904_p4, 1, 0 }
   0xd   : > { %s2247_s22 = scalar_select %p1909_p6, 1, 0 }
   0xe   : > { %p1914_p8 = pnand %p1263_p5, %p142_p7  ;;  %s154_s25 = sshll.u32 %s1836_s24, 4  ;;  %s1918_s25 = int_to_ptr.vmem [resolvable:$true] %s154_s25 }
   0xf   : > { %s1837_s27 = smov [#allocation8]   ;;  %s1838_s29 = smov [#allocation9]  }
  0x10   : > { %s2248_s23 = scalar_select %p1914_p8, 1, 0 }
  0x11   : > { %p1523_p9 = pneg %p1914_p8  ;;  %s168_s28 = sshll.u32 %s1837_s27, 4  ;;  %s1929_s28 = int_to_ptr.vmem [resolvable:$true] %s168_s28 }
  0x12   : > { %s1931_s30 = sshll.u32 %s1838_s29, 4  ;;  %s1646_s7 = scalar_lea.hbm %s2239_s1, 4608  ;;  %s180_s30 = int_to_ptr.vmem [resolvable:$true] %s1931_s30 }
  0x13   : > { %p1925_p11 = pnand %p1523_p9, %p2243_p1  ;;  %p1647_p12 = scmp.ne.s32.totalorder %s2239_s1, %s1646_s7 }
  0x14   : > { %p1653_p5 = scmp.lt.u32.totalorder %s1646_s7, %s2239_s1 }
  0x15   : > { %p1941_p13 = pneg %p1925_p11 }
  0x17   : > { %p1649_p0 = pnand %p1941_p13, %p1647_p12 }
  0x19   : > { %p1650_p3 = pneg %p1649_p0 }
  0x1b   : > { %p1655_p7 = pnand %p1653_p5, %p1650_p3 }
  0x1d   : > { %1658 = shalt.err (!%p1655_p7)
}
  0x1e   : > { %s1659_s13 = scalar_lea.vmem %s1918_s25, 4608  ;;  %p1667_p2 = scmp.lt.s32.totalorder %s1918_s25, %s1918_s25 }
  0x1f   : > { %p1660_p9 = scmp.ne.s32.totalorder %s1918_s25, %s1659_s13  ;;  %p1668_p6 = scmp.lt.s32.totalorder %s1659_s13, %s1659_s13 }
  0x21   : > { %p1662_p10 = pnand %p1660_p9, %p1941_p13  ;;  %p1669_p12 = por %p1668_p6, %p1667_p2 }
  0x23   : > { %p1663_p1 = pneg %p1662_p10 }
  0x25   : > { %p1670_p0 = pnand %p1669_p12, %p1663_p1 }
  0x27   : > { %1673 = shalt.err (!%p1670_p0)
}
  0x28   : > { %s1839_s14 = smov 64   ;;  %s1840_s20 = smov 4  }
  0x29   : > { %1526 = dma.hbm_to_vmem [thread:$0]  (!%p1925_p11), %s2239_s1, 4608, %s1918_s25, [#allocation7], %s1839_s14, %s1839_s14, %s1840_s20  }
  0x2a   : > { %s1674_s6 = scalar_lea.hbm %s2240_s2, 16 }
  0x2b   : > { %p1675_p2 = scmp.ne.s32.totalorder %s2240_s2, %s1674_s6  ;;  %p1681_p10 = scmp.lt.u32.totalorder %s1674_s6, %s2240_s2 }
  0x2d   : > { %p1677_p1 = pnand %p1675_p2, %p1941_p13 }
  0x2f   : > { %p1678_p6 = pneg %p1677_p1 }
  0x31   : > { %p1683_p3 = pnand %p1681_p10, %p1678_p6 }
  0x33   : > { %1686 = shalt.err (!%p1683_p3)
}
  0x34   : > { %s1687_s25 = scalar_lea.vmem %s1929_s28, 16  ;;  %s1694_s12 = scalar_lea.vmem %s1929_s28, 32 }
  0x35   : > { %p1688_p5 = scmp.ne.s32.totalorder %s1929_s28, %s1687_s25  ;;  %p1695_p12 = scmp.lt.s32.totalorder %s1929_s28, %s1929_s28 }
  0x36   : > { %p1696_p0 = scmp.lt.s32.totalorder %s1694_s12, %s1687_s25 }
  0x37   : > { %p1690_p7 = pnand %p1688_p5, %p1941_p13 }
  0x38   : > { %p1697_p2 = por %p1696_p0, %p1695_p12 }
  0x39   : > { %p1691_p9 = pneg %p1690_p7 }
  0x3b   : > { %p1698_p1 = pnand %p1697_p2, %p1691_p9 }
  0x3d   : > { %1701 = shalt.err (!%p1698_p1)
}
  0x3e   : > { %1529 = dma.hbm_to_vmem [thread:$0]  (!%p1925_p11), %s2240_s2, 16, %s1929_s28, [#allocation7]  }
  0x3f   : > { %s1702_s27 = scalar_lea.hbm %s2241_s3, 16 }
  0x40   : > { %p1703_p6 = scmp.ne.s32.totalorder %s2241_s3, %s1702_s27  ;;  %p1709_p5 = scmp.lt.u32.totalorder %s1702_s27, %s2241_s3 }
  0x42   : > { %p1705_p10 = pnand %p1703_p6, %p1941_p13 }
  0x44   : > { %p1706_p3 = pneg %p1705_p10 }
  0x46   : > { %p1711_p7 = pnand %p1709_p5, %p1706_p3 }
  0x48   : > { %1714 = shalt.err (!%p1711_p7)
}
  0x49   : > { %s1715_s8 = scalar_lea.vmem %s180_s30, 16  ;;  %s1722_s28 = scalar_lea.vmem %s180_s30, 32 }
  0x4a   : > { %p1716_p9 = scmp.ne.s32.totalorder %s180_s30, %s1715_s8  ;;  %p1723_p2 = scmp.lt.s32.totalorder %s180_s30, %s180_s30 }
  0x4b   : > { %p1724_p1 = scmp.lt.s32.totalorder %s1722_s28, %s1715_s8 }
  0x4c   : > { %p1718_p12 = pnand %p1716_p9, %p1941_p13 }
  0x4d   : > { %p1725_p4 = por %p1724_p1, %p1723_p2 }
  0x4e   : > { %p1719_p0 = pneg %p1718_p12 }
  0x50   : > { %p1726_p8 = pnand %p1725_p4, %p1719_p0 }
  0x52   : > { %1729 = shalt.err (!%p1726_p8)
}
  0x53   : > { %1532 = dma.hbm_to_vmem [thread:$0]  (!%p1925_p11), %s2241_s3, 16, %s180_s30, [#allocation10]  }
  0x54   : > { %s2006_s10 = sadd.s32 1, %s1834_s18   ;;  %s29_s26 = sadd.s32 1, %s1830_s17 }
  0x55   : > { %s26_s25 = ssub.s32 %s1834_s18, %s2006_s10  ;;  %p36_p8 = scmp.ne.s32.totalorder %s1830_s17, %s1826_s16 }
  0x56   : > { %p27_p4 = scmp.eq.s32.totalorder %s26_s25, 0  ;;  %p37_p13 = scmp.eq.s32.totalorder %s1834_s18, 0 }
  0x57   : > { %p1544_p6 = scmp.lt.s32.totalorder %s1834_s18, 2  ;;  %p2251_p3 = scmp.eq.s32.totalorder %s1895_s19, 1 }
  0x58   : > { %s2016_s12 = scalar_select %p27_p4, %s1830_s17, %s29_s26  }
  0x59   : > { %p38_p10 = por %p37_p13, %p36_p8  ;;  %p2020_p5 = por %p2251_p3, %p36_p8 }
  0x5a   : > { %s190_s14 = sand.u32 1, %s1830_s17   ;;  %s1505_s20 = smul.u32 768, %s1834_s18 }
  0x5b   : > { %s1504_s30 = smul.u32 48, %s190_s14  ;;  %p2031_p11 = pnand %p1544_p6, %p38_p10 }
  0x5c   : > { %s2029_s29 = scalar_lea.hbm %s2238_s0, %s1505_s20  ;;  %s2037_s8 = scalar_lea.sflag [#allocation4], %s190_s14 }
  0x5d   : > { %s194_s6 = scalar_lea.vmem [#allocation3], %s1504_s30  ;;  %s1730_s28 = scalar_lea.hbm %s2029_s29, 768 }
  0x5e   : > { %s201_s7 = sshll.u32 %s194_s6, 4  ;;  %p1731_p7 = scmp.ne.s32.totalorder %s2029_s29, %s1730_s28  ;;  %s2035_s7 = int_to_ptr.vmem [resolvable:$true] %s201_s7 }
  0x5f   : > { %p1732_p9 = pneg %p2031_p11  ;;  %s1735_s25 = scalar_lea.hbm %s2238_s0, 1536 }
  0x60   : > { %p1736_p2 = scmp.lt.u32.totalorder %s2029_s29, %s2238_s0  ;;  %p1737_p1 = scmp.lt.u32.totalorder %s1735_s25, %s1730_s28 }
  0x61   : > { %p1733_p12 = pnand %p1732_p9, %p1731_p7  ;;  %p1739_p8 = scmp.lt.u32.totalorder %s1730_s28, %s2029_s29 }
  0x62   : > { %p1738_p4 = por %p1737_p1, %p1736_p2 }
  0x63   : > { %p1734_p0 = pneg %p1733_p12 }
  0x64   : > { %p1740_p13 = por %p1739_p8, %p1738_p4 }
  0x66   : > { %p1741_p6 = pnand %p1740_p13, %p1734_p0 }
  0x68   : > { %1744 = shalt.err (!%p1741_p6)
}
  0x69   : > { %s1745_s14 = scalar_lea.vmem %s2035_s7, 768  ;;  %s1841_s30 = smov [#allocation3]  }
  0x6a   : > { %p1746_p10 = scmp.ne.s32.totalorder %s2035_s7, %s1745_s14  ;;  %s1750_s24 = sshll.u32 %s1841_s30, 4  ;;  %s1751_s24 = int_to_ptr.vmem [resolvable:$false] %s1750_s24 }
  0x6b   : > { %s1752_s27 = scalar_lea.vmem %s1751_s24, 1536  ;;  %p1753_p12 = scmp.lt.s32.totalorder %s2035_s7, %s1751_s24 }
  0x6c   : > { %p1748_p3 = pnand %p1746_p10, %p1732_p9  ;;  %p1754_p2 = scmp.lt.s32.totalorder %s1752_s27, %s1745_s14 }
  0x6e   : > { %p1749_p7 = pneg %p1748_p3  ;;  %p1755_p1 = por %p1754_p2, %p1753_p12 }
  0x70   : > { %p1756_p4 = pnand %p1755_p1, %p1749_p7 }
  0x72   : > { %1759 = shalt.err (!%p1756_p4)
}
  0x73   : > { %s1842_s6 = smov 128   ;;  %s1843_s28 = smov 8  }
  0x74   : > { %1536 = dma.hbm_to_vmem [thread:$0]  (!%p2031_p11), %s2029_s29, 768, %s2035_s7, %s2037_s8, %s1842_s6, %s1842_s6, %s1843_s28  }
  0x75   : > { %p2254_p9 = scmp.ne.s32.totalorder %s2248_s23, 0 }
  0x76   : > { %s2068_s9 = sand.u32 (!%p2254_p9), 1, %s1826_s16   ;;  %p2255_p0 = scmp.ne.s32.totalorder (!%p2254_p9), %s2246_s21, 0 }
  0x77   : > { %213 = sbr.rel (%p2254_p9) target bundleno = 474 (0x1da), region = 36  ;;  %s216_s25 = scalar_lea.sflag (!%p2254_p9), [#allocation4], %s2068_s9 }
  0x78   : > { %s1506_s11 = smul.u32 (!%p2254_p9), 48, %s2068_s9 }
  0x7a   : > { %s2072_s26 = scalar_lea.vmem (!%p2254_p9), [#allocation3], %s1506_s11 }
  0x7e   : > { %1805 = dma.done.wait (%p2255_p0), %s216_s25, 768  }
  0x7f   : > { %1807 = vsyncadd (%p2255_p0), %s216_s25, 4294966528  ;;  %p2256_p11 = scmp.eq.s32.totalorder %s1895_s19, 0 }
  0x81   : > { %1809 = dma.done.wait (%p2256_p11), [#allocation7], 4624   ;;  %p2257_p8 = pmov %p2256_p11 }
  0x83   : > { %1811 = vsyncadd (%p2257_p8), [#allocation7], 4294962672  ;;  %p2258_p13 = pmov %p2257_p8 }
  0x84   : > { %p2259_p6 = pmov %p2257_p8 }
  0x85   : > { %1813 = dma.done.wait (%p2258_p13), [#allocation10], 16  }
  0x86   : > { %1815 = vsyncadd (%p2259_p6), [#allocation10], 4294967280  ;;  %v1844_v0 = vmov 0.0   ;;  %vm1845_vm0 = vmmov 0   ;;  %v1592_v1 = vld [vmem:[#allocation6] sm:$0xff]   ;;  %v1593_v2 = vld [vmem:[#allocation6 + $0x8] sm:$0xff]  }
  0x87   : > { %1396 = vmatprep.subr.bf16.mxu0 %v1844_v0  ;;  %1408 = vmatprep.subr.bf16.mxu1 %v1844_v0  ;;  %v1594_v3 = vld [vmem:[#allocation6 + $0x20] sm:$0xff]   ;;  %v1596_v4 = vld [vmem:[#allocation6 + $0x28] sm:$0xff]   ;;  %v1595_v5 = vld [vmem:[#allocation6 + $0x10] sm:$0xff]   ;;  %vm302_vm1 = vcmask 523264   ;;  %vm347_vm2 = vcmask 195584   ;;  %s1273_s21 = sshll.u32 %s2068_s9, 4 }
  0x88   : > { %1404 = vmatprep.mubr.msk.bf16.mxu0 %vm1845_vm0, %v1844_v0  ;;  %1416 = vmatprep.mubr.msk.bf16.mxu1 %vm1845_vm0, %v1844_v0  ;;  %v1597_v6 = vld [vmem:[#allocation6 + $0x18] sm:$0xff]   ;;  %v1598_v7 = vld [vmem:[#allocation6 + $0x30] sm:$0xff]   ;;  %v1601_v14 = vld [vmem:[#allocation6 + $0x40] sm:$0xff]   ;;  %s1350_s23 = sshll.u32 %s1895_s19, 8  ;;  %s255_s29 = scalar_lea.vmem [#allocation11], %s1273_s21 }
  0x89   : > { %1397 = vmatpush3.bf16.msra.mxu0 %v1592_v1  ;;  %1409 = vmatpush3.bf16.msra.mxu1 %v1594_v3  ;;  %v1599_v8 = vld [vmem:[%s2072_s26] ss:$8 sps:$4 sm:$0xff]   ;;  %v1600_v9 = vld [vmem:[%s2072_s26 + $0x10] ss:$8 sps:$4 sm:$0xff]   ;;  %s1160_s5 = sshll.u32 %s255_s29, 4  ;;  %s2190_s20 = scalar_lea.hbm %s2242_s4, %s1350_s23  ;;  %s2192_s5 = int_to_ptr.vmem [resolvable:$true] %s1160_s5 }
  0x8a   : > { %1398 = vmatprep.subr.bf16.mxu0 %v1844_v0  ;;  %1410 = vmatprep.subr.bf16.mxu1 %v1844_v0  ;;  %v1602_v10 = vld [vmem:[#allocation6 + $0x38] sm:$0xff]   ;;  %v269_v13 = vpack.c.bf16 %v1600_v9, %v1599_v8  ;;  %v1607_v16 = vld [vmem:[#allocation6 + $0x60] sm:$0xff]   ;;  %v1605_v17 = vld [vmem:[#allocation6 + $0x48] sm:$0xff]   ;;  %s1147_s19 = scalar_lea.sflag [#allocation5], %s2068_s9  ;;  %s1760_s14 = scalar_lea.vmem %s2192_s5, 256 }
  0x8b   : > { %v1603_v11 = vld [vmem:[%s2072_s26 + $0x1] ss:$8 sps:$4 sm:$0xff]   ;;  %v1604_v12 = vld [vmem:[%s2072_s26 + $0x11] ss:$8 sps:$4 sm:$0xff]   ;;  %p1761_p10 = scmp.ne.s32.totalorder %s2192_s5, %s1760_s14  ;;  %s1846_s30 = smov [#allocation11]  }
  0x8c   : > { %v362_v15 = vpack.c.bf16 %v1604_v12, %v1603_v11  ;;  %v1609_v18 = vld [vmem:[#allocation6 + $0x68] sm:$0xff]   ;;  %v1606_v19 = vld [vmem:[#allocation6 + $0x50] sm:$0xff]   ;;  %v1608_v21 = vld [vmem:[#allocation6 + $0x58] sm:$0xff]   ;;  %s1764_s24 = sshll.u32 %s1846_s30, 4  ;;  %s1765_s24 = int_to_ptr.vmem [resolvable:$false] %s1764_s24 }
  0x8d   : > { %1399 = vmatpush3.bf16.msra.mxu0 %v1593_v2  ;;  %1411 = vmatpush3.bf16.msra.mxu1 %v1596_v4  ;;  %v1612_v20 = vld [vmem:[#allocation6 + $0x70] sm:$0xff]   ;;  %v1614_v26 = vld [vmem:[#allocation6 + $0x78] sm:$0xff]   ;;  %v1613_v28 = vld [vmem:[#allocation6 + $0x80] sm:$0xff]   ;;  %p1762_p3 = pnand %p1761_p10, %p2020_p5  ;;  %s1766_s27 = scalar_lea.vmem %s1765_s24, 512 }
  0x8e   : > { %1400 = vmatprep.subr.bf16.mxu0 %v1844_v0  ;;  %1412 = vmatprep.subr.bf16.mxu1 %v1844_v0  ;;  %v1610_v22 = vld [vmem:[%s2072_s26 + $0x2] ss:$8 sps:$4 sm:$0xff]   ;;  %v1611_v23 = vld [vmem:[%s2072_s26 + $0x12] ss:$8 sps:$4 sm:$0xff]   ;;  %p1767_p12 = scmp.lt.s32.totalorder %s2192_s5, %s1765_s24  ;;  %p1768_p2 = scmp.lt.s32.totalorder %s1766_s27, %s1760_s14 }
  0x8f   : > { %v1616_v24 = vld [vmem:[%s2072_s26 + $0x8] ss:$8 sps:$4 sm:$0xff]   ;;  %v1617_v25 = vld [vmem:[%s2072_s26 + $0x18] ss:$8 sps:$4 sm:$0xff]   ;;  %v458_v27 = vpack.c.bf16 %v1611_v23, %v1610_v22  ;;  %p1763_p7 = pneg %p1762_p3 }
  0x90   : > { %v555_v29 = vpack.c.bf16 %v1617_v25, %v1616_v24  ;;  %v1619_v30 = vld [vmem:[#allocation6 + $0xa0] sm:$0xff]   ;;  %v1615_v31 = vld [vmem:[#allocation6 + $0x88] sm:$0xff]   ;;  %v1618_v33 = vld [vmem:[#allocation6 + $0x90] sm:$0xff]   ;;  %p1769_p1 = por %p1768_p2, %p1767_p12 }
  0x91   : > { %1401 = vmatpush3.bf16.msra.mxu0 %v1595_v5  ;;  %1413 = vmatpush3.bf16.msra.mxu1 %v1598_v7  ;;  %v1621_v32 = vld [vmem:[#allocation6 + $0xa8] sm:$0xff]   ;;  %v1620_v35 = vld [vmem:[#allocation6 + $0x98] sm:$0xff]   ;;  %v1624_v36 = vld [vmem:[#allocation6 + $0xb0] sm:$0xff]  }
  0x92   : > { %1402 = vmatprep.subr.bf16.mxu0 %v1844_v0  ;;  %1414 = vmatprep.subr.bf16.mxu1 %v1844_v0  ;;  %v1622_v34 = vld [vmem:[%s2072_s26 + $0x9] ss:$8 sps:$4 sm:$0xff]   ;;  %v1623_v37 = vld [vmem:[%s2072_s26 + $0x19] ss:$8 sps:$4 sm:$0xff]   ;;  %p1770_p4 = pnand %p1769_p1, %p1763_p7 }
  0x93   : > { %v1628_v38 = vld [vmem:[%s2072_s26 + $0xa] ss:$8 sps:$4 sm:$0xff]   ;;  %v1629_v39 = vld [vmem:[%s2072_s26 + $0x1a] ss:$8 sps:$4 sm:$0xff]   ;;  %v651_v41 = vpack.c.bf16 %v1623_v37, %v1622_v34 }
  0x94   : > { %v1626_v40 = vld [vmem:[#allocation6 + $0xb8] sm:$0xff]   ;;  %v1625_v42 = vld [vmem:[#allocation6 + $0xc0] sm:$0xff]   ;;  %v747_v43 = vpack.c.bf16 %v1629_v39, %v1628_v38  ;;  %v1627_v45 = vld [vmem:[#allocation6 + $0xc8] sm:$0xff]  }
  0x95   : > { %1403 = vmatpush3.bf16.msra.mxu0 %v1597_v6  ;;  %1415 = vmatpush3.bf16.msra.mxu1 %v1602_v10  ;;  %v1631_v44 = vld [vmem:[#allocation6 + $0xe0] sm:$0xff]   ;;  %v1633_v46 = vld [vmem:[#allocation6 + $0xe8] sm:$0xff]   ;;  %v1630_v47 = vld [vmem:[#allocation6 + $0xd0] sm:$0xff]  }
  0x96   : > { %1420 = vmatprep.subr.bf16.mxu0 %v1844_v0  ;;  %1432 = vmatprep.subr.bf16.mxu1 %v1844_v0  ;;  %v1636_v48 = vld [vmem:[#allocation6 + $0xf0] sm:$0xff]   ;;  %v1632_v51 = vld [vmem:[#allocation6 + $0xd8] sm:$0xff]   ;;  %v1637_v56 = vld [vmem:[#allocation6 + $0x100] sm:$0xff]  }
  0x97   : > { %v1634_v49 = vld [vmem:[%s2072_s26 + $0x10] ss:$8 sps:$4 sm:$0xff]   ;;  %v1635_v50 = vld [vmem:[%s2072_s26 + $0x20] ss:$8 sps:$4 sm:$0xff]  }
  0x98   : > { %1405 = vmatmul.mubr.msk.bf16.vlgmr.msra.gmra.mrb[0].mxu0 %vm302_vm1, %v269_v13  ;;  %1417 = vmatmul.mubr.msk.bf16.vlgmr.msra.gmra.mrb[0].mxu1 %vm302_vm1, %v362_v15  ;;  %v1640_v52 = vld [vmem:[%s2072_s26 + $0x11] ss:$8 sps:$4 sm:$0xff]   ;;  %v1641_v53 = vld [vmem:[%s2072_s26 + $0x21] ss:$8 sps:$4 sm:$0xff]   ;;  %v844_v55 = vpack.c.bf16 %v1635_v50, %v1634_v49 }
  0x99   : > { %1421 = vmatpush3.bf16.msra.mxu0 %v1601_v14  ;;  %1428 = vmatprep.mubr.msk.bf16.mxu0 %vm1845_vm0, %v1844_v0  ;;  %v1638_v54 = vld [vmem:[#allocation6 + $0xf8] sm:$0xff]   ;;  %v940_v57 = vpack.c.bf16 %v1641_v53, %v1640_v52  ;;  %v1639_v58 = vld [vmem:[#allocation6 + $0x108] sm:$0xff]   ;;  %v1642_v59 = vld [vmem:[#allocation6 + $0x110] sm:$0xff]  }
  0x9a   : > { %1422 = vmatprep.subr.bf16.mxu0 %v1844_v0  ;;  %1433 = vmatpush3.bf16.msra.mxu1 %v1607_v16  ;;  %v1644_v60 = vld [vmem:[%s2072_s26 + $0x12] ss:$8 sps:$4 sm:$0xff]   ;;  %v1645_v61 = vld [vmem:[%s2072_s26 + $0x22] ss:$8 sps:$4 sm:$0xff]  }
  0x9b   : > { %1440 = vmatprep.mubr.msk.bf16.mxu1 %vm1845_vm0, %v1844_v0  ;;  %1434 = vmatprep.subr.bf16.mxu1 %v1844_v0  ;;  %v1643_v62 = vld [vmem:[#allocation6 + $0x118] sm:$0xff]   ;;  %v1036_v63 = vpack.c.bf16 %v1645_v61, %v1644_v60 }
  0x9d   : > { %1423 = vmatpush3.bf16.msra.mxu0 %v1605_v17 }
  0x9e   : > { %1424 = vmatprep.subr.bf16.mxu0 %v1844_v0  ;;  %1435 = vmatpush3.bf16.msra.mxu1 %v1609_v18 }
  0x9f   : > { %1436 = vmatprep.subr.bf16.mxu1 %v1844_v0 }
  0xa1   : > { %1425 = vmatpush3.bf16.msra.mxu0 %v1606_v19 }
  0xa2   : > { %1426 = vmatprep.subr.bf16.mxu0 %v1844_v0  ;;  %1437 = vmatpush3.bf16.msra.mxu1 %v1612_v20 }
  0xa3   : > { %1438 = vmatprep.subr.bf16.mxu1 %v1844_v0 }
  0xa5   : > { %1427 = vmatpush3.bf16.msra.mxu0 %v1608_v21 }
  0xa6   : > { %1444 = vmatprep.subr.bf16.mxu0 %v1844_v0  ;;  %1439 = vmatpush3.bf16.msra.mxu1 %v1614_v26 }
  0xa7   : > { %1456 = vmatprep.subr.bf16.mxu1 %v1844_v0 }
  0xa8   : > { %1429 = vmatmul.mubr.msk.bf16.vlgmr.msra.gmra.mrb[4].mxu0 %vm302_vm1, %v458_v27 }
  0xa9   : > { %1445 = vmatpush3.bf16.msra.mxu0 %v1613_v28  ;;  %1452 = vmatprep.mubr.msk.bf16.mxu0 %vm1845_vm0, %v1844_v0 }
  0xaa   : > { %1446 = vmatprep.subr.bf16.mxu0 %v1844_v0  ;;  %1441 = vmatmul.mubr.msk.bf16.vlgmr.msra.gmra.mrb[4].mxu1 %vm302_vm1, %v555_v29 }
  0xab   : > { %1457 = vmatpush3.bf16.msra.mxu1 %v1619_v30  ;;  %1464 = vmatprep.mubr.msk.bf16.mxu1 %vm1845_vm0, %v1844_v0 }
  0xac   : > { %1458 = vmatprep.subr.bf16.mxu1 %v1844_v0 }
  0xad   : > { %1447 = vmatpush3.bf16.msra.mxu0 %v1615_v31 }
  0xae   : > { %1448 = vmatprep.subr.bf16.mxu0 %v1844_v0 }
  0xaf   : > { %1459 = vmatpush3.bf16.msra.mxu1 %v1621_v32 }
  0xb0   : > { %1460 = vmatprep.subr.bf16.mxu1 %v1844_v0 }
  0xb1   : > { %1449 = vmatpush3.bf16.msra.mxu0 %v1618_v33 }
  0xb2   : > { %1450 = vmatprep.subr.bf16.mxu0 %v1844_v0 }
  0xb3   : > { %1461 = vmatpush3.bf16.msra.mxu1 %v1624_v36 }
  0xb4   : > { %1462 = vmatprep.subr.bf16.mxu1 %v1844_v0 }
  0xb5   : > { %1451 = vmatpush3.bf16.msra.mxu0 %v1620_v35 }
  0xb6   : > { %1468 = vmatprep.subr.bf16.mxu0 %v1844_v0 }
  0xb7   : > { %1463 = vmatpush3.bf16.msra.mxu1 %v1626_v40 }
  0xb8   : > { %1453 = vmatmul.mubr.msk.bf16.vlgmr.msra.gmra.mrb[8].mxu0 %vm302_vm1, %v651_v41  ;;  %1480 = vmatprep.subr.bf16.mxu1 %v1844_v0 }
  0xb9   : > { %1469 = vmatpush3.bf16.msra.mxu0 %v1625_v42  ;;  %1476 = vmatprep.mubr.msk.bf16.mxu0 %vm1845_vm0, %v1844_v0 }
  0xba   : > { %1470 = vmatprep.subr.bf16.mxu0 %v1844_v0  ;;  %1465 = vmatmul.mubr.msk.bf16.vlgmr.msra.gmra.mrb[8].mxu1 %vm302_vm1, %v747_v43 }
  0xbb   : > { %1481 = vmatpush3.bf16.msra.mxu1 %v1631_v44  ;;  %1488 = vmatprep.mubr.msk.bf16.mxu1 %vm1845_vm0, %v1844_v0 }
  0xbc   : > { %1482 = vmatprep.subr.bf16.mxu1 %v1844_v0 }
  0xbd   : > { %1471 = vmatpush3.bf16.msra.mxu0 %v1627_v45 }
  0xbe   : > { %1472 = vmatprep.subr.bf16.mxu0 %v1844_v0 }
  0xbf   : > { %1483 = vmatpush3.bf16.msra.mxu1 %v1633_v46 }
  0xc0   : > { %1484 = vmatprep.subr.bf16.mxu1 %v1844_v0 }
  0xc1   : > { %1473 = vmatpush3.bf16.msra.mxu0 %v1630_v47 }
  0xc2   : > { %1474 = vmatprep.subr.bf16.mxu0 %v1844_v0 }
  0xc3   : > { %1485 = vmatpush3.bf16.msra.mxu1 %v1636_v48 }
  0xc4   : > { %1486 = vmatprep.subr.bf16.mxu1 %v1844_v0 }
  0xc5   : > { %1475 = vmatpush3.bf16.msra.mxu0 %v1632_v51 }
  0xc6   : > { %1492 = vmatprep.subr.bf16.mxu0 %v1844_v0 }
  0xc7   : > { %1487 = vmatpush3.bf16.msra.mxu1 %v1638_v54 }
  0xc8   : > { %1477 = vmatmul.mubr.msk.bf16.vlgmr.msra.gmra.mrb[12].mxu0 %vm302_vm1, %v844_v55 }
  0xc9   : > { %1493 = vmatpush3.bf16.msra.mxu0 %v1637_v56  ;;  %1500 = vmatprep.mubr.msk.bf16.mxu0 %vm1845_vm0, %v1844_v0 }
  0xca   : > { %1494 = vmatprep.subr.bf16.mxu0 %v1844_v0  ;;  %1489 = vmatmul.mubr.msk.bf16.vlgmr.msra.gmra.mrb[12].mxu1 %vm302_vm1, %v940_v57 }
  0xcd   : > { %1495 = vmatpush3.bf16.msra.mxu0 %v1639_v58 }
  0xce   : > { %1496 = vmatprep.subr.bf16.mxu0 %v1844_v0 }
  0xd1   : > { %1497 = vmatpush3.bf16.msra.mxu0 %v1642_v59 }
  0xd2   : > { %1498 = vmatprep.subr.bf16.mxu0 %v1844_v0 }
  0xd5   : > { %1499 = vmatpush3.bf16.msra.mxu0 %v1643_v62 }
  0xd8   : > { %1501 = vmatmul.mubr.msk.bf16.vlgmr.msra.gmra.mrb[16].mxu0 %vm302_vm1, %v1036_v63 }
 0x16b   : > { %v340_v1 = vpop.f32.mrb[0].mxu0  ;;  %v433_v4 = vpop.f32.mrb[0].mxu1 }
 0x16c   : > { %348 = vst.msk [vmem:[#allocation2] sm:$0xff] %vm347_vm2, %v340_v1  ;;  %v1406_v2 = vpop.f32.mrb[1].mxu0  ;;  %v1418_v6 = vpop.f32.mrb[1].mxu1 }
 0x16d   : > { %v343_v3 = vpop.f32.mrb[2].mxu0  ;;  %v436_v7 = vpop.f32.mrb[2].mxu1 }
 0x16e   : > { %349 = vst.msk [vmem:[#allocation2 + $0x8] sm:$0xff] %vm347_vm2, %v343_v3  ;;  %v1407_v5 = vpop.f32.mrb[3].mxu0  ;;  %v1419_v8 = vpop.f32.mrb[3].mxu1 }
 0x16f   : > { %v1343_v5 = vld [vmem:[#allocation8] ss:$0 sm:$0xff] }
 0x173   : > { %v440_v9 = vld [vmem:[#allocation2] sm:$0xff] }
 0x174   : > { %v442_v10 = vadd.f32 %v440_v9, %v433_v4 }
 0x175   : > { %v441_v0 = vld [vmem:[#allocation2 + $0x8] sm:$0xff] }
 0x176   : > { %444 = vst.msk [vmem:[#allocation2] sm:$0xff] %vm347_vm2, %v442_v10  ;;  %v443_v11 = vadd.f32 %v441_v0, %v436_v7  ;;  %v1344_v7 = vld [vmem:[#allocation9] ss:$0 sm:$0xff] }
 0x178   : > { %445 = vst.msk [vmem:[#allocation2 + $0x8] sm:$0xff] %vm347_vm2, %v443_v11 }
 0x17b   : > { %v529_v12 = vpop.f32.mrb[4].mxu0 }
 0x17c   : > { %v1430_v13 = vpop.f32.mrb[5].mxu0 }
 0x17d   : > { %v536_v14 = vld [vmem:[#allocation2] sm:$0xff]  ;;  %v532_v15 = vpop.f32.mrb[6].mxu0  ;;  %v626_v16 = vpop.f32.mrb[4].mxu1 }
 0x17e   : > { %v538_v17 = vadd.f32 %v536_v14, %v529_v12  ;;  %v1431_v18 = vpop.f32.mrb[7].mxu0  ;;  %v1442_v19 = vpop.f32.mrb[5].mxu1 }
 0x17f   : > { %v537_v20 = vld [vmem:[#allocation2 + $0x8] sm:$0xff]  ;;  %v629_v21 = vpop.f32.mrb[6].mxu1 }
 0x180   : > { %540 = vst.msk [vmem:[#allocation2] sm:$0xff] %vm347_vm2, %v538_v17  ;;  %v539_v22 = vadd.f32 %v537_v20, %v532_v15  ;;  %v1443_v23 = vpop.f32.mrb[7].mxu1 }
 0x182   : > { %541 = vst.msk [vmem:[#allocation2 + $0x8] sm:$0xff] %vm347_vm2, %v539_v22 }
 0x187   : > { %v633_v24 = vld [vmem:[#allocation2] sm:$0xff] }
 0x188   : > { %v635_v25 = vadd.f32 %v633_v24, %v626_v16 }
 0x189   : > { %v634_v26 = vld [vmem:[#allocation2 + $0x8] sm:$0xff] }
 0x18a   : > { %637 = vst.msk [vmem:[#allocation2] sm:$0xff] %vm347_vm2, %v635_v25  ;;  %v636_v27 = vadd.f32 %v634_v26, %v629_v21 }
 0x18b   : > { %v722_v28 = vpop.f32.mrb[8].mxu0 }
 0x18c   : > { %638 = vst.msk [vmem:[#allocation2 + $0x8] sm:$0xff] %vm347_vm2, %v636_v27  ;;  %v1454_v29 = vpop.f32.mrb[9].mxu0 }
 0x18d   : > { %v725_v30 = vpop.f32.mrb[10].mxu0  ;;  %v818_v31 = vpop.f32.mrb[8].mxu1 }
 0x18e   : > { %v1455_v32 = vpop.f32.mrb[11].mxu0  ;;  %v1466_v33 = vpop.f32.mrb[9].mxu1 }
 0x18f   : > { %v821_v34 = vpop.f32.mrb[10].mxu1 }
 0x190   : > { %v1467_v35 = vpop.f32.mrb[11].mxu1 }
 0x191   : > { %v729_v36 = vld [vmem:[#allocation2] sm:$0xff] }
 0x192   : > { %v731_v37 = vadd.f32 %v729_v36, %v722_v28 }
 0x193   : > { %v730_v38 = vld [vmem:[#allocation2 + $0x8] sm:$0xff] }
 0x194   : > { %733 = vst.msk [vmem:[#allocation2] sm:$0xff] %vm347_vm2, %v731_v37  ;;  %v732_v39 = vadd.f32 %v730_v38, %v725_v30 }
 0x196   : > { %734 = vst.msk [vmem:[#allocation2 + $0x8] sm:$0xff] %vm347_vm2, %v732_v39 }
 0x19b   : > { %v825_v40 = vld [vmem:[#allocation2] sm:$0xff]  ;;  %v915_v41 = vpop.f32.mrb[12].mxu0 }
 0x19c   : > { %v827_v42 = vadd.f32 %v825_v40, %v818_v31  ;;  %v1478_v43 = vpop.f32.mrb[13].mxu0 }
 0x19d   : > { %v826_v44 = vld [vmem:[#allocation2 + $0x8] sm:$0xff]  ;;  %v918_v45 = vpop.f32.mrb[14].mxu0  ;;  %v1011_v46 = vpop.f32.mrb[12].mxu1 }
 0x19e   : > { %829 = vst.msk [vmem:[#allocation2] sm:$0xff] %vm347_vm2, %v827_v42  ;;  %v828_v47 = vadd.f32 %v826_v44, %v821_v34  ;;  %v1479_v48 = vpop.f32.mrb[15].mxu0  ;;  %v1490_v49 = vpop.f32.mrb[13].mxu1 }
 0x19f   : > { %v1014_v50 = vpop.f32.mrb[14].mxu1 }
 0x1a0   : > { %830 = vst.msk [vmem:[#allocation2 + $0x8] sm:$0xff] %vm347_vm2, %v828_v47  ;;  %v1491_v51 = vpop.f32.mrb[15].mxu1 }
 0x1a5   : > { %v922_v52 = vld [vmem:[#allocation2] sm:$0xff] }
 0x1a6   : > { %v924_v53 = vadd.f32 %v922_v52, %v915_v41 }
 0x1a7   : > { %v923_v54 = vld [vmem:[#allocation2 + $0x8] sm:$0xff] }
 0x1a8   : > { %926 = vst.msk [vmem:[#allocation2] sm:$0xff] %vm347_vm2, %v924_v53  ;;  %v925_v55 = vadd.f32 %v923_v54, %v918_v45 }
 0x1aa   : > { %927 = vst.msk [vmem:[#allocation2 + $0x8] sm:$0xff] %vm347_vm2, %v925_v55 }
 0x1ab   : > { %v1107_v56 = vpop.f32.mrb[16].mxu0 }
 0x1ac   : > { %v1502_v57 = vpop.f32.mrb[17].mxu0 }
 0x1ad   : > { %v1110_v58 = vpop.f32.mrb[18].mxu0 }
 0x1ae   : > { %v1503_v59 = vpop.f32.mrb[19].mxu0 }
 0x1af   : > { %v1018_v60 = vld [vmem:[#allocation2] sm:$0xff] }
 0x1b0   : > { %v1020_v61 = vadd.f32 %v1018_v60, %v1011_v46 }
 0x1b1   : > { %v1019_v62 = vld [vmem:[#allocation2 + $0x8] sm:$0xff] }
 0x1b2   : > { %1022 = vst.msk [vmem:[#allocation2] sm:$0xff] %vm347_vm2, %v1020_v61  ;;  %v1021_v63 = vadd.f32 %v1019_v62, %v1014_v50 }
 0x1b4   : > { %1023 = vst.msk [vmem:[#allocation2 + $0x8] sm:$0xff] %vm347_vm2, %v1021_v63 }
 0x1b9   : > { %v1114_v1 = vld [vmem:[#allocation2] sm:$0xff] }
 0x1ba   : > { %v1116_v2 = vadd.f32 %v1114_v1, %v1107_v56 }
 0x1bb   : > { %v1115_v3 = vld [vmem:[#allocation2 + $0x8] sm:$0xff] }
 0x1bc   : > { %1118 = vst.msk [vmem:[#allocation2] sm:$0xff] %vm347_vm2, %v1116_v2  ;;  %v1117_v4 = vadd.f32 %v1115_v3, %v1110_v58 }
 0x1be   : > { %1119 = vst.msk [vmem:[#allocation2 + $0x8] sm:$0xff] %vm347_vm2, %v1117_v4 }
 0x1c3   : > { %v1120_v6 = vld [vmem:[#allocation2] sm:$0xff] }
 0x1c4   : > { %v1129_v8 = vadd.f32 %v1343_v5, %v1120_v6 }
 0x1c5   : > { %v1121_v9 = vld [vmem:[#allocation2 + $0x8] sm:$0xff] }
 0x1c6   : > { %v1130_v10 = vadd.f32 %v1343_v5, %v1121_v9  ;;  %vm1131_vm3 = vcmp.ge.f32.partialorder %v1129_v8, 0.0  ;;  %v1140_v0 = vmul.f32 %v1344_v7, %v1129_v8 }
 0x1c8   : > { %vm1132_vm4 = vcmp.ge.f32.partialorder %v1130_v10, 0.0  ;;  %v1141_v11 = vmul.f32 %v1344_v7, %v1130_v10  ;;  %v1142_v12 = vsel %vm1131_vm3, %v1129_v8, %v1140_v0 }
 0x1c9   : > { %1144 = vst.msk [vmem:[%s255_s29] sm:$0xff] %vm347_vm2, %v1142_v12 }
 0x1ca   : > { %v1143_v13 = vsel %vm1132_vm4, %v1130_v10, %v1141_v11 }
 0x1cb   : > { %1145 = vst.msk [vmem:[%s255_s29 + $0x8] sm:$0xff] %vm347_vm2, %v1143_v13 }
 0x1cc   : > { %1773 = shalt.err (!%p1770_p4)
}
 0x1cd   : > { %s1774_s6 = scalar_lea.hbm %s2190_s20, 256  ;;  %s1778_s25 = scalar_lea.hbm %s2242_s4, 512 }
 0x1ce   : > { %p1775_p9 = scmp.ne.s32.totalorder %s2190_s20, %s1774_s6  ;;  %p1779_p8 = scmp.lt.u32.totalorder %s2190_s20, %s2242_s4 }
 0x1cf   : > { %p1780_p13 = scmp.lt.u32.totalorder %s1778_s25, %s1774_s6  ;;  %p1782_p10 = scmp.lt.u32.totalorder %s1774_s6, %s2190_s20 }
 0x1d0   : > { %p1776_p0 = pnand %p1775_p9, %p2020_p5 }
 0x1d1   : > { %p1781_p6 = por %p1780_p13, %p1779_p8 }
 0x1d2   : > { %p1777_p11 = pneg %p1776_p0 }
 0x1d3   : > { %p1783_p3 = por %p1782_p10, %p1781_p6 }
 0x1d5   : > { %p1784_p7 = pnand %p1783_p3, %p1777_p11 }
 0x1d7   : > { %1787 = shalt.err (!%p1784_p7)
}
 0x1d8   : > { %s1847_s23 = smov 128   ;;  %s1848_s29 = smov 8  }
 0x1d9   : > { %1521 = dma.vmem_to_hbm [thread:$0]  (%p2020_p5), %s2192_s5, 256, %s2190_s20, %s1147_s19, %s1847_s23, %s1847_s23, %s1848_s29  }
 0x1da PF: > { %s1175_s7 = sand.u32 1, %s1822_s15   ;;  %p2260_p12 = scmp.ne.s32.totalorder %s2247_s22, 0 }
 0x1db   : > { %p2261_p2 = scmp.ge.s32.totalorder %s1834_s18, 2  ;;  %s1176_s8 = scalar_lea.sflag [#allocation5], %s1175_s7 }
 0x1dd   : > { %p1538_p1 = pnand %p2261_p2, %p2260_p12 }
 0x1df   : > { %1817 = dma.done.wait (!%p1538_p1), %s1176_s8, 256  }
 0x1e0   : > { %1819 = vsyncadd (!%p1538_p1), %s1176_s8, 4294967040  ;;  %p19_p4 = scmp.ge.s32.totalorder %s2006_s10, 4   ;;  %s2262_s15 = smov %s1826_s16 }
 0x1e1   : > { %s2263_s16 = smov %s1830_s17  ;;  %s2264_s17 = smov %s2016_s12 }
 0x1e2   : > { %s2265_s18 = smov %s2006_s10  ;;  %21 = sbr.rel (!%p19_p4) target bundleno = 7 (0x7), region = 103 }
 0x1e9   :  { %1181 = vsyncpa [#allocation4], 1 }
 0x1ea   :  { %1183 = vsyncpa [#allocation4 + $0x1], 1 }
 0x1eb   :  { %1184 = vsyncpa [#allocation7], 1 }
 0x1ec   :  { %1185 = vsyncpa [#allocation10], 1 }
 0x1ed   :  { %1186 = vsyncpa [#allocation5], 1 }
 0x1ee   :  { %1188 = vsyncpa [#allocation5 + $0x1], 1 }

</bundles_post_ra>
